<compile_context>
chip_gen: v7x
topology: tpu7x:2x2x1
jax: 0.10.0
libtpu: 0.0.40
codegen_flags: <defaults>
</compile_context>

<pallas_src>
import jax
import jax.numpy as jnp
import numpy as np
from jax import lax
from jax.experimental import pallas as pl
from jax.experimental.pallas import tpu as pltpu

K = 3  # kernel_size of both convolutions


def unet_down(x, w1, b1, g1, be1, m1, v1, w2, b2, g2, be2, m2, v2,
              eps=1e-5, compute_dtype=jnp.bfloat16):
    """Eval-mode UnetDown forward.

    x:  (N, Cin, H, W)      NCHW, like the PyTorch module.
    w1: (Cout, Cin, K, K)   OIHW (PyTorch conv weight layout); w2: (Cout, Cout, K, K).
    Returns (y, ft): y (N, Cout, Hp, Wp), ft (N, Cout, H2, W2).
    """
    N, Cin, H, W = x.shape
    Cout = w1.shape[0]
    H1, W1 = H - K + 1, W - K + 1          # after conv1 (VALID)
    H2, W2 = H1 - K + 1, W1 - K + 1        # after conv2 (VALID)
    Hp, Wp = H2 // 2, W2 // 2              # after 2x2 / stride-2 maxpool

    # Padded-stride stage widths: every stage keeps row stride W on the lane
    # axis, so a conv tap (dy, dx) is a lane-offset window of dy*W + dx.
    # Junk columns are carried along and stripped by the wrapper.
    smax = (K - 1) * W + (K - 1)           # largest tap offset
    FW = H2 * W                            # ft stage width (rows h2 = 0..H2-1)
    PW = (2 * Hp - 1) * W                  # pooled stage width
    S2 = max(FW, PW + W + 1)               # act2 width
    S1 = S2 + smax                         # act1 width
    SX = S1 + smax                         # padded input width

    # ---- fold BatchNorm (eval) into conv weights + per-channel shift -------
    s1 = g1 / jnp.sqrt(v1 + eps)
    t1 = (be1 + (b1 - m1) * s1).astype(jnp.float32).reshape(Cout, 1)
    s2 = g2 / jnp.sqrt(v2 + eps)
    t2 = (be2 + (b2 - m2) * s2).astype(jnp.float32).reshape(Cout, 1)
    # Per-tap transposed weights: w_t[dy*K+dx, co, ci] = w[co, ci, dy, dx]*s[co]
    w1t = (w1 * s1[:, None, None, None]).transpose(2, 3, 0, 1) \
        .reshape(K * K, Cout, Cin).astype(compute_dtype)
    w2t = (w2 * s2[:, None, None, None]).transpose(2, 3, 0, 1) \
        .reshape(K * K, Cout, Cout).astype(compute_dtype)

    # Input: NCHW with spatial flattened on lanes, zero-padded tail.
    x_k = jnp.pad(x.reshape(N, Cin, H * W).astype(jnp.float32),
                  ((0, 0), (0, 0), (0, SX - H * W)))

    cdt = compute_dtype

    def kernel(x_ref, w1_ref, t1_ref, w2_ref, t2_ref, y_ref, ft_ref, a1_ref):
        # ---- conv1 + bn1 + relu: K*K tap-accumulated matmuls (f32 acc) -----
        acc1 = None
        for t in range(K * K):
            s = (t // K) * W + (t % K)
            tap = x_ref[0, :, pl.ds(s, S1)].astype(cdt)        # (Cin, S1)
            d = jnp.dot(w1_ref[t], tap, preferred_element_type=jnp.float32)
            acc1 = d if acc1 is None else acc1 + d
        a1_ref[...] = jnp.maximum(acc1 + t1_ref[...], 0.0)     # (Cout, S1) f32

        # ---- conv2 + bn2 + relu (taps read back from VMEM scratch) ---------
        acc2 = None
        for t in range(K * K):
            s = (t // K) * W + (t % K)
            tap = a1_ref[:, pl.ds(s, S2)].astype(cdt)          # (Cout, S2)
            d = jnp.dot(w2_ref[t], tap, preferred_element_type=jnp.float32)
            acc2 = d if acc2 is None else acc2 + d
        a2 = jnp.maximum(acc2 + t2_ref[...], 0.0)              # (Cout, S2) f32

        # ---- features + fused 2x2/stride-2 maxpool (lane-dense stores) -----
        ft_ref[0] = a2[:, :FW].astype(ft_ref.dtype)
        pooled = jnp.maximum(
            jnp.maximum(a2[:, 0:PW], a2[:, 1:PW + 1]),
            jnp.maximum(a2[:, W:W + PW], a2[:, W + 1:W + 1 + PW]))
        y_ref[0] = pooled.astype(y_ref.dtype)

    y_pad, ft_pad = pl.pallas_call(
        kernel,
        out_shape=(jax.ShapeDtypeStruct((N, Cout, PW), jnp.float32),
                   jax.ShapeDtypeStruct((N, Cout, FW), jnp.float32)),
        grid=(N,),
        in_specs=[
            pl.BlockSpec((1, Cin, SX), lambda n: (n, 0, 0)),
            pl.BlockSpec((K * K, Cout, Cin), lambda n: (0, 0, 0)),
            pl.BlockSpec((Cout, 1), lambda n: (0, 0)),
            pl.BlockSpec((K * K, Cout, Cout), lambda n: (0, 0, 0)),
            pl.BlockSpec((Cout, 1), lambda n: (0, 0)),
        ],
        out_specs=(
            pl.BlockSpec((1, Cout, PW), lambda n: (n, 0, 0)),   # pooled (padded)
            pl.BlockSpec((1, Cout, FW), lambda n: (n, 0, 0)),   # features (padded)
        ),
        scratch_shapes=[pltpu.VMEM((Cout, S1), jnp.float32)],   # staged act1
        compiler_params=pltpu.CompilerParams(
            dimension_semantics=("parallel",),
            vmem_limit_bytes=32 * 1024 * 1024),
    )(x_k, w1t, t1, w2t, t2)

    # Strip padding / decimate (tiny XLA slices; the reshapes are free).
    ft = ft_pad.reshape(N, Cout, H2, W)[:, :, :, :W2]
    y = y_pad.reshape(N, Cout, 2 * Hp - 1, W)[:, :, 0:2 * Hp:2, 0:2 * Wp:2]
    return y, ft


if __name__ == "__main__":
    N, Cin, Cout, H, W = 2, 4, 8, 16, 16
    eps = 1e-5

    key = jax.random.PRNGKey(0)
    (k1, k2, k3, k4, k5, k6, k7, k8, k9, k10, kx) = jax.random.split(key, 11)

    # Conv weights: normal(0, sqrt(2/(k*k*fan_in))) as in the PyTorch module (OIHW).
    std1 = float(np.sqrt(2.0 / (K * K * Cin)))
    std2 = float(np.sqrt(2.0 / (K * K * Cout)))
    w1 = jax.random.normal(k1, (Cout, Cin, K, K), jnp.float32) * std1
    w2 = jax.random.normal(k2, (Cout, Cout, K, K), jnp.float32) * std2
    fan1, fan2 = Cin * K * K, Cout * K * K
    b1 = jax.random.uniform(k3, (Cout,), jnp.float32,
                            -1.0 / np.sqrt(fan1), 1.0 / np.sqrt(fan1))
    b2 = jax.random.uniform(k4, (Cout,), jnp.float32,
                            -1.0 / np.sqrt(fan2), 1.0 / np.sqrt(fan2))

    # Non-trivial BatchNorm params / running stats (exercises the full folding).
    g1 = 1.0 + 0.1 * jax.random.normal(k5, (Cout,), jnp.float32)
    be1 = 0.1 * jax.random.normal(k6, (Cout,), jnp.float32)
    m1 = 0.1 * jax.random.normal(k7, (Cout,), jnp.float32)
    v1 = jax.random.uniform(k8, (Cout,), jnp.float32, 0.5, 1.5)
    g2 = 1.0 + 0.1 * jax.random.normal(k9, (Cout,), jnp.float32)
    be2 = 0.1 * jax.random.normal(k10, (Cout,), jnp.float32)
    m2 = 0.05 * jnp.ones((Cout,), jnp.float32)
    v2 = jnp.linspace(0.8, 1.2, Cout).astype(jnp.float32)

    x = jax.random.normal(kx, (N, Cin, H, W), jnp.float32)

    # Default bf16 MXU path + f32 parity path.
    y_bf, ft_bf = unet_down(x, w1, b1, g1, be1, m1, v1,
                            w2, b2, g2, be2, m2, v2, eps=eps)
    y_f, ft_f = unet_down(x, w1, b1, g1, be1, m1, v1,
                          w2, b2, g2, be2, m2, v2, eps=eps,
                          compute_dtype=jnp.float32)
    jax.block_until_ready((y_bf, ft_bf, y_f, ft_f))

    # Pure-JAX reference (eval-mode semantics, NCHW / OIHW like PyTorch).
    def conv(xx, ww, bb):
        return lax.conv_general_dilated(
            xx, ww, (1, 1), "VALID",
            dimension_numbers=("NCHW", "OIHW", "NCHW")) + bb[None, :, None, None]

    def bn(xx, g, be, m, v):
        c = lambda a: a[None, :, None, None]
        return (xx - c(m)) / jnp.sqrt(c(v) + eps) * c(g) + c(be)

    a1 = jax.nn.relu(bn(conv(x, w1, b1), g1, be1, m1, v1))
    ft_ref = jax.nn.relu(bn(conv(a1, w2, b2), g2, be2, m2, v2))
    y_ref = lax.reduce_window(ft_ref, -jnp.inf, lax.max,
                              (1, 1, 2, 2), (1, 1, 2, 2), "VALID")

    # f32 compute path: tight parity with the f32 reference.
    assert np.allclose(np.asarray(ft_f), np.asarray(ft_ref), atol=2e-4, rtol=2e-4), \
        float(np.max(np.abs(np.asarray(ft_f) - np.asarray(ft_ref))))
    assert np.allclose(np.asarray(y_f), np.asarray(y_ref), atol=2e-4, rtol=2e-4), \
        float(np.max(np.abs(np.asarray(y_f) - np.asarray(y_ref))))
    # bf16 MXU path (default): loose tolerance (bf16 inputs, f32 accumulation).
    assert np.allclose(np.asarray(ft_bf), np.asarray(ft_ref), atol=1e-1, rtol=1e-1), \
        float(np.max(np.abs(np.asarray(ft_bf) - np.asarray(ft_ref))))
    assert np.allclose(np.asarray(y_bf), np.asarray(y_ref), atol=1e-1, rtol=1e-1), \
        float(np.max(np.abs(np.asarray(y_bf) - np.asarray(y_ref))))
    print("KERNEL_OK")
</pallas_src>

<mosaic_0001>
module attributes {stable_mosaic.version = 11 : i64} {
  func.func @kernel(%arg0: i32, %arg1: memref<1x4x261xf32, #tpu.memory_space<vmem>>, %arg2: memref<9x8x4xbf16, #tpu.memory_space<vmem>>, %arg3: memref<8x1xf32, #tpu.memory_space<vmem>>, %arg4: memref<9x8x8xbf16, #tpu.memory_space<vmem>>, %arg5: memref<8x1xf32, #tpu.memory_space<vmem>>, %arg6: memref<1x8x176xf32, #tpu.memory_space<vmem>>, %arg7: memref<1x8x192xf32, #tpu.memory_space<vmem>>, %arg8: memref<8x227xf32, #tpu.memory_space<vmem>>) attributes {dimension_semantics = [#tpu.dimension_semantics<parallel>], iteration_bounds = array<i64: 2>, scalar_prefetch = 0 : i64, scratch_operands = 1 : i64, tpu.core_type = #tpu.core_type<tc>, window_params = [{transform_indices = @transform_0, window_bounds = array<i64: 1, 4, 261>}, {pipeline_mode = #tpu.pipeline_mode<synchronous>, transform_indices = @transform_1, window_bounds = array<i64: 9, 8, 4>}, {pipeline_mode = #tpu.pipeline_mode<synchronous>, transform_indices = @transform_2, window_bounds = array<i64: 8, 1>}, {pipeline_mode = #tpu.pipeline_mode<synchronous>, transform_indices = @transform_3, window_bounds = array<i64: 9, 8, 8>}, {pipeline_mode = #tpu.pipeline_mode<synchronous>, transform_indices = @transform_4, window_bounds = array<i64: 8, 1>}, {transform_indices = @transform_5, window_bounds = array<i64: 1, 8, 176>}, {transform_indices = @transform_6, window_bounds = array<i64: 1, 8, 192>}]} {
    %c0 = arith.constant 0 : index
    %c0_0 = arith.constant 0 : index
    %c0_1 = arith.constant 0 : index
    %0 = vector.load %arg1[%c0, %c0_0, %c0_1] : memref<1x4x261xf32, #tpu.memory_space<vmem>>, vector<1x4x227xf32>
    %1 = vector.shape_cast %0 : vector<1x4x227xf32> to vector<4x227xf32>
    %2 = arith.truncf %1 : vector<4x227xf32> to vector<4x227xbf16>
    %c0_2 = arith.constant 0 : index
    %c0_3 = arith.constant 0 : index
    %c0_4 = arith.constant 0 : index
    %3 = vector.load %arg2[%c0_2, %c0_3, %c0_4] : memref<9x8x4xbf16, #tpu.memory_space<vmem>>, vector<1x8x4xbf16>
    %4 = vector.shape_cast %3 : vector<1x8x4xbf16> to vector<8x4xbf16>
    %cst = arith.constant dense<0.000000e+00> : vector<8x227xf32>
    %5 = tpu.matmul %4, %2, %cst {dimension_numbers = #tpu.dot_dimension_numbers<[1], [0], [0], [1], [0, 0, 1, 1], [], []>} : vector<8x4xbf16>, vector<4x227xbf16>, vector<8x227xf32> -> vector<8x227xf32>
    %c0_5 = arith.constant 0 : index
    %c0_6 = arith.constant 0 : index
    %c1 = arith.constant 1 : index
    %6 = vector.load %arg1[%c0_5, %c0_6, %c1] : memref<1x4x261xf32, #tpu.memory_space<vmem>>, vector<1x4x227xf32>
    %7 = vector.shape_cast %6 : vector<1x4x227xf32> to vector<4x227xf32>
    %8 = arith.truncf %7 : vector<4x227xf32> to vector<4x227xbf16>
    %c1_7 = arith.constant 1 : index
    %c0_8 = arith.constant 0 : index
    %c0_9 = arith.constant 0 : index
    %9 = vector.load %arg2[%c1_7, %c0_8, %c0_9] : memref<9x8x4xbf16, #tpu.memory_space<vmem>>, vector<1x8x4xbf16>
    %10 = vector.shape_cast %9 : vector<1x8x4xbf16> to vector<8x4xbf16>
    %cst_10 = arith.constant dense<0.000000e+00> : vector<8x227xf32>
    %11 = tpu.matmul %10, %8, %cst_10 {dimension_numbers = #tpu.dot_dimension_numbers<[1], [0], [0], [1], [0, 0, 1, 1], [], []>} : vector<8x4xbf16>, vector<4x227xbf16>, vector<8x227xf32> -> vector<8x227xf32>
    %12 = arith.addf %5, %11 : vector<8x227xf32>
    %c0_11 = arith.constant 0 : index
    %c0_12 = arith.constant 0 : index
    %c2 = arith.constant 2 : index
    %13 = vector.load %arg1[%c0_11, %c0_12, %c2] : memref<1x4x261xf32, #tpu.memory_space<vmem>>, vector<1x4x227xf32>
    %14 = vector.shape_cast %13 : vector<1x4x227xf32> to vector<4x227xf32>
    %15 = arith.truncf %14 : vector<4x227xf32> to vector<4x227xbf16>
    %c2_13 = arith.constant 2 : index
    %c0_14 = arith.constant 0 : index
    %c0_15 = arith.constant 0 : index
    %16 = vector.load %arg2[%c2_13, %c0_14, %c0_15] : memref<9x8x4xbf16, #tpu.memory_space<vmem>>, vector<1x8x4xbf16>
    %17 = vector.shape_cast %16 : vector<1x8x4xbf16> to vector<8x4xbf16>
    %cst_16 = arith.constant dense<0.000000e+00> : vector<8x227xf32>
    %18 = tpu.matmul %17, %15, %cst_16 {dimension_numbers = #tpu.dot_dimension_numbers<[1], [0], [0], [1], [0, 0, 1, 1], [], []>} : vector<8x4xbf16>, vector<4x227xbf16>, vector<8x227xf32> -> vector<8x227xf32>
    %19 = arith.addf %12, %18 : vector<8x227xf32>
    %c0_17 = arith.constant 0 : index
    %c0_18 = arith.constant 0 : index
    %c16 = arith.constant 16 : index
    %20 = vector.load %arg1[%c0_17, %c0_18, %c16] : memref<1x4x261xf32, #tpu.memory_space<vmem>>, vector<1x4x227xf32>
    %21 = vector.shape_cast %20 : vector<1x4x227xf32> to vector<4x227xf32>
    %22 = arith.truncf %21 : vector<4x227xf32> to vector<4x227xbf16>
    %c3 = arith.constant 3 : index
    %c0_19 = arith.constant 0 : index
    %c0_20 = arith.constant 0 : index
    %23 = vector.load %arg2[%c3, %c0_19, %c0_20] : memref<9x8x4xbf16, #tpu.memory_space<vmem>>, vector<1x8x4xbf16>
    %24 = vector.shape_cast %23 : vector<1x8x4xbf16> to vector<8x4xbf16>
    %cst_21 = arith.constant dense<0.000000e+00> : vector<8x227xf32>
    %25 = tpu.matmul %24, %22, %cst_21 {dimension_numbers = #tpu.dot_dimension_numbers<[1], [0], [0], [1], [0, 0, 1, 1], [], []>} : vector<8x4xbf16>, vector<4x227xbf16>, vector<8x227xf32> -> vector<8x227xf32>
    %26 = arith.addf %19, %25 : vector<8x227xf32>
    %c0_22 = arith.constant 0 : index
    %c0_23 = arith.constant 0 : index
    %c17 = arith.constant 17 : index
    %27 = vector.load %arg1[%c0_22, %c0_23, %c17] : memref<1x4x261xf32, #tpu.memory_space<vmem>>, vector<1x4x227xf32>
    %28 = vector.shape_cast %27 : vector<1x4x227xf32> to vector<4x227xf32>
    %29 = arith.truncf %28 : vector<4x227xf32> to vector<4x227xbf16>
    %c4 = arith.constant 4 : index
    %c0_24 = arith.constant 0 : index
    %c0_25 = arith.constant 0 : index
    %30 = vector.load %arg2[%c4, %c0_24, %c0_25] : memref<9x8x4xbf16, #tpu.memory_space<vmem>>, vector<1x8x4xbf16>
    %31 = vector.shape_cast %30 : vector<1x8x4xbf16> to vector<8x4xbf16>
    %cst_26 = arith.constant dense<0.000000e+00> : vector<8x227xf32>
    %32 = tpu.matmul %31, %29, %cst_26 {dimension_numbers = #tpu.dot_dimension_numbers<[1], [0], [0], [1], [0, 0, 1, 1], [], []>} : vector<8x4xbf16>, vector<4x227xbf16>, vector<8x227xf32> -> vector<8x227xf32>
    %33 = arith.addf %26, %32 : vector<8x227xf32>
    %c0_27 = arith.constant 0 : index
    %c0_28 = arith.constant 0 : index
    %c18 = arith.constant 18 : index
    %34 = vector.load %arg1[%c0_27, %c0_28, %c18] : memref<1x4x261xf32, #tpu.memory_space<vmem>>, vector<1x4x227xf32>
    %35 = vector.shape_cast %34 : vector<1x4x227xf32> to vector<4x227xf32>
    %36 = arith.truncf %35 : vector<4x227xf32> to vector<4x227xbf16>
    %c5 = arith.constant 5 : index
    %c0_29 = arith.constant 0 : index
    %c0_30 = arith.constant 0 : index
    %37 = vector.load %arg2[%c5, %c0_29, %c0_30] : memref<9x8x4xbf16, #tpu.memory_space<vmem>>, vector<1x8x4xbf16>
    %38 = vector.shape_cast %37 : vector<1x8x4xbf16> to vector<8x4xbf16>
    %cst_31 = arith.constant dense<0.000000e+00> : vector<8x227xf32>
    %39 = tpu.matmul %38, %36, %cst_31 {dimension_numbers = #tpu.dot_dimension_numbers<[1], [0], [0], [1], [0, 0, 1, 1], [], []>} : vector<8x4xbf16>, vector<4x227xbf16>, vector<8x227xf32> -> vector<8x227xf32>
    %40 = arith.addf %33, %39 : vector<8x227xf32>
    %c0_32 = arith.constant 0 : index
    %c0_33 = arith.constant 0 : index
    %c32 = arith.constant 32 : index
    %41 = vector.load %arg1[%c0_32, %c0_33, %c32] : memref<1x4x261xf32, #tpu.memory_space<vmem>>, vector<1x4x227xf32>
    %42 = vector.shape_cast %41 : vector<1x4x227xf32> to vector<4x227xf32>
    %43 = arith.truncf %42 : vector<4x227xf32> to vector<4x227xbf16>
    %c6 = arith.constant 6 : index
    %c0_34 = arith.constant 0 : index
    %c0_35 = arith.constant 0 : index
    %44 = vector.load %arg2[%c6, %c0_34, %c0_35] : memref<9x8x4xbf16, #tpu.memory_space<vmem>>, vector<1x8x4xbf16>
    %45 = vector.shape_cast %44 : vector<1x8x4xbf16> to vector<8x4xbf16>
    %cst_36 = arith.constant dense<0.000000e+00> : vector<8x227xf32>
    %46 = tpu.matmul %45, %43, %cst_36 {dimension_numbers = #tpu.dot_dimension_numbers<[1], [0], [0], [1], [0, 0, 1, 1], [], []>} : vector<8x4xbf16>, vector<4x227xbf16>, vector<8x227xf32> -> vector<8x227xf32>
    %47 = arith.addf %40, %46 : vector<8x227xf32>
    %c0_37 = arith.constant 0 : index
    %c0_38 = arith.constant 0 : index
    %c33 = arith.constant 33 : index
    %48 = vector.load %arg1[%c0_37, %c0_38, %c33] : memref<1x4x261xf32, #tpu.memory_space<vmem>>, vector<1x4x227xf32>
    %49 = vector.shape_cast %48 : vector<1x4x227xf32> to vector<4x227xf32>
    %50 = arith.truncf %49 : vector<4x227xf32> to vector<4x227xbf16>
    %c7 = arith.constant 7 : index
    %c0_39 = arith.constant 0 : index
    %c0_40 = arith.constant 0 : index
    %51 = vector.load %arg2[%c7, %c0_39, %c0_40] : memref<9x8x4xbf16, #tpu.memory_space<vmem>>, vector<1x8x4xbf16>
    %52 = vector.shape_cast %51 : vector<1x8x4xbf16> to vector<8x4xbf16>
    %cst_41 = arith.constant dense<0.000000e+00> : vector<8x227xf32>
    %53 = tpu.matmul %52, %50, %cst_41 {dimension_numbers = #tpu.dot_dimension_numbers<[1], [0], [0], [1], [0, 0, 1, 1], [], []>} : vector<8x4xbf16>, vector<4x227xbf16>, vector<8x227xf32> -> vector<8x227xf32>
    %54 = arith.addf %47, %53 : vector<8x227xf32>
    %c0_42 = arith.constant 0 : index
    %c0_43 = arith.constant 0 : index
    %c34 = arith.constant 34 : index
    %55 = vector.load %arg1[%c0_42, %c0_43, %c34] : memref<1x4x261xf32, #tpu.memory_space<vmem>>, vector<1x4x227xf32>
    %56 = vector.shape_cast %55 : vector<1x4x227xf32> to vector<4x227xf32>
    %57 = arith.truncf %56 : vector<4x227xf32> to vector<4x227xbf16>
    %c8 = arith.constant 8 : index
    %c0_44 = arith.constant 0 : index
    %c0_45 = arith.constant 0 : index
    %58 = vector.load %arg2[%c8, %c0_44, %c0_45] : memref<9x8x4xbf16, #tpu.memory_space<vmem>>, vector<1x8x4xbf16>
    %59 = vector.shape_cast %58 : vector<1x8x4xbf16> to vector<8x4xbf16>
    %cst_46 = arith.constant dense<0.000000e+00> : vector<8x227xf32>
    %60 = tpu.matmul %59, %57, %cst_46 {dimension_numbers = #tpu.dot_dimension_numbers<[1], [0], [0], [1], [0, 0, 1, 1], [], []>} : vector<8x4xbf16>, vector<4x227xbf16>, vector<8x227xf32> -> vector<8x227xf32>
    %61 = arith.addf %54, %60 : vector<8x227xf32>
    %c0_47 = arith.constant 0 : index
    %c0_48 = arith.constant 0 : index
    %62 = vector.load %arg3[%c0_47, %c0_48] : memref<8x1xf32, #tpu.memory_space<vmem>>, vector<8x1xf32>
    %63 = vector.broadcast %62 : vector<8x1xf32> to vector<8x227xf32>
    %64 = arith.addf %61, %63 : vector<8x227xf32>
    %cst_49 = arith.constant 0.000000e+00 : f32
    %65 = vector.broadcast %cst_49 : f32 to vector<8x227xf32>
    %66 = arith.maximumf %64, %65 : vector<8x227xf32>
    %c0_50 = arith.constant 0 : index
    %c0_51 = arith.constant 0 : index
    %67 = vector.load %arg8[%c0_50, %c0_51] : memref<8x227xf32, #tpu.memory_space<vmem>>, vector<8x227xf32>
    tpu.vector_store %arg8[%c0_50, %c0_51], %66 {strides = array<i32>} : memref<8x227xf32, #tpu.memory_space<vmem>>, vector<8x227xf32>,
    %c0_52 = arith.constant 0 : index
    %c0_53 = arith.constant 0 : index
    %68 = vector.load %arg8[%c0_52, %c0_53] : memref<8x227xf32, #tpu.memory_space<vmem>>, vector<8x193xf32>
    %69 = arith.truncf %68 : vector<8x193xf32> to vector<8x193xbf16>
    %c0_54 = arith.constant 0 : index
    %c0_55 = arith.constant 0 : index
    %c0_56 = arith.constant 0 : index
    %70 = vector.load %arg4[%c0_54, %c0_55, %c0_56] : memref<9x8x8xbf16, #tpu.memory_space<vmem>>, vector<1x8x8xbf16>
    %71 = vector.shape_cast %70 : vector<1x8x8xbf16> to vector<8x8xbf16>
    %cst_57 = arith.constant dense<0.000000e+00> : vector<8x193xf32>
    %72 = tpu.matmul %71, %69, %cst_57 {dimension_numbers = #tpu.dot_dimension_numbers<[1], [0], [0], [1], [0, 0, 1, 1], [], []>} : vector<8x8xbf16>, vector<8x193xbf16>, vector<8x193xf32> -> vector<8x193xf32>
    %c0_58 = arith.constant 0 : index
    %c1_59 = arith.constant 1 : index
    %73 = vector.load %arg8[%c0_58, %c1_59] : memref<8x227xf32, #tpu.memory_space<vmem>>, vector<8x193xf32>
    %74 = arith.truncf %73 : vector<8x193xf32> to vector<8x193xbf16>
    %c1_60 = arith.constant 1 : index
    %c0_61 = arith.constant 0 : index
    %c0_62 = arith.constant 0 : index
    %75 = vector.load %arg4[%c1_60, %c0_61, %c0_62] : memref<9x8x8xbf16, #tpu.memory_space<vmem>>, vector<1x8x8xbf16>
    %76 = vector.shape_cast %75 : vector<1x8x8xbf16> to vector<8x8xbf16>
    %cst_63 = arith.constant dense<0.000000e+00> : vector<8x193xf32>
    %77 = tpu.matmul %76, %74, %cst_63 {dimension_numbers = #tpu.dot_dimension_numbers<[1], [0], [0], [1], [0, 0, 1, 1], [], []>} : vector<8x8xbf16>, vector<8x193xbf16>, vector<8x193xf32> -> vector<8x193xf32>
    %78 = arith.addf %72, %77 : vector<8x193xf32>
    %c0_64 = arith.constant 0 : index
    %c2_65 = arith.constant 2 : index
    %79 = vector.load %arg8[%c0_64, %c2_65] : memref<8x227xf32, #tpu.memory_space<vmem>>, vector<8x193xf32>
    %80 = arith.truncf %79 : vector<8x193xf32> to vector<8x193xbf16>
    %c2_66 = arith.constant 2 : index
    %c0_67 = arith.constant 0 : index
    %c0_68 = arith.constant 0 : index
    %81 = vector.load %arg4[%c2_66, %c0_67, %c0_68] : memref<9x8x8xbf16, #tpu.memory_space<vmem>>, vector<1x8x8xbf16>
    %82 = vector.shape_cast %81 : vector<1x8x8xbf16> to vector<8x8xbf16>
    %cst_69 = arith.constant dense<0.000000e+00> : vector<8x193xf32>
    %83 = tpu.matmul %82, %80, %cst_69 {dimension_numbers = #tpu.dot_dimension_numbers<[1], [0], [0], [1], [0, 0, 1, 1], [], []>} : vector<8x8xbf16>, vector<8x193xbf16>, vector<8x193xf32> -> vector<8x193xf32>
    %84 = arith.addf %78, %83 : vector<8x193xf32>
    %c0_70 = arith.constant 0 : index
    %c16_71 = arith.constant 16 : index
    %85 = vector.load %arg8[%c0_70, %c16_71] : memref<8x227xf32, #tpu.memory_space<vmem>>, vector<8x193xf32>
    %86 = arith.truncf %85 : vector<8x193xf32> to vector<8x193xbf16>
    %c3_72 = arith.constant 3 : index
    %c0_73 = arith.constant 0 : index
    %c0_74 = arith.constant 0 : index
    %87 = vector.load %arg4[%c3_72, %c0_73, %c0_74] : memref<9x8x8xbf16, #tpu.memory_space<vmem>>, vector<1x8x8xbf16>
    %88 = vector.shape_cast %87 : vector<1x8x8xbf16> to vector<8x8xbf16>
    %cst_75 = arith.constant dense<0.000000e+00> : vector<8x193xf32>
    %89 = tpu.matmul %88, %86, %cst_75 {dimension_numbers = #tpu.dot_dimension_numbers<[1], [0], [0], [1], [0, 0, 1, 1], [], []>} : vector<8x8xbf16>, vector<8x193xbf16>, vector<8x193xf32> -> vector<8x193xf32>
    %90 = arith.addf %84, %89 : vector<8x193xf32>
    %c0_76 = arith.constant 0 : index
    %c17_77 = arith.constant 17 : index
    %91 = vector.load %arg8[%c0_76, %c17_77] : memref<8x227xf32, #tpu.memory_space<vmem>>, vector<8x193xf32>
    %92 = arith.truncf %91 : vector<8x193xf32> to vector<8x193xbf16>
    %c4_78 = arith.constant 4 : index
    %c0_79 = arith.constant 0 : index
    %c0_80 = arith.constant 0 : index
    %93 = vector.load %arg4[%c4_78, %c0_79, %c0_80] : memref<9x8x8xbf16, #tpu.memory_space<vmem>>, vector<1x8x8xbf16>
    %94 = vector.shape_cast %93 : vector<1x8x8xbf16> to vector<8x8xbf16>
    %cst_81 = arith.constant dense<0.000000e+00> : vector<8x193xf32>
    %95 = tpu.matmul %94, %92, %cst_81 {dimension_numbers = #tpu.dot_dimension_numbers<[1], [0], [0], [1], [0, 0, 1, 1], [], []>} : vector<8x8xbf16>, vector<8x193xbf16>, vector<8x193xf32> -> vector<8x193xf32>
    %96 = arith.addf %90, %95 : vector<8x193xf32>
    %c0_82 = arith.constant 0 : index
    %c18_83 = arith.constant 18 : index
    %97 = vector.load %arg8[%c0_82, %c18_83] : memref<8x227xf32, #tpu.memory_space<vmem>>, vector<8x193xf32>
    %98 = arith.truncf %97 : vector<8x193xf32> to vector<8x193xbf16>
    %c5_84 = arith.constant 5 : index
    %c0_85 = arith.constant 0 : index
    %c0_86 = arith.constant 0 : index
    %99 = vector.load %arg4[%c5_84, %c0_85, %c0_86] : memref<9x8x8xbf16, #tpu.memory_space<vmem>>, vector<1x8x8xbf16>
    %100 = vector.shape_cast %99 : vector<1x8x8xbf16> to vector<8x8xbf16>
    %cst_87 = arith.constant dense<0.000000e+00> : vector<8x193xf32>
    %101 = tpu.matmul %100, %98, %cst_87 {dimension_numbers = #tpu.dot_dimension_numbers<[1], [0], [0], [1], [0, 0, 1, 1], [], []>} : vector<8x8xbf16>, vector<8x193xbf16>, vector<8x193xf32> -> vector<8x193xf32>
    %102 = arith.addf %96, %101 : vector<8x193xf32>
    %c0_88 = arith.constant 0 : index
    %c32_89 = arith.constant 32 : index
    %103 = vector.load %arg8[%c0_88, %c32_89] : memref<8x227xf32, #tpu.memory_space<vmem>>, vector<8x193xf32>
    %104 = arith.truncf %103 : vector<8x193xf32> to vector<8x193xbf16>
    %c6_90 = arith.constant 6 : index
    %c0_91 = arith.constant 0 : index
    %c0_92 = arith.constant 0 : index
    %105 = vector.load %arg4[%c6_90, %c0_91, %c0_92] : memref<9x8x8xbf16, #tpu.memory_space<vmem>>, vector<1x8x8xbf16>
    %106 = vector.shape_cast %105 : vector<1x8x8xbf16> to vector<8x8xbf16>
    %cst_93 = arith.constant dense<0.000000e+00> : vector<8x193xf32>
    %107 = tpu.matmul %106, %104, %cst_93 {dimension_numbers = #tpu.dot_dimension_numbers<[1], [0], [0], [1], [0, 0, 1, 1], [], []>} : vector<8x8xbf16>, vector<8x193xbf16>, vector<8x193xf32> -> vector<8x193xf32>
    %108 = arith.addf %102, %107 : vector<8x193xf32>
    %c0_94 = arith.constant 0 : index
    %c33_95 = arith.constant 33 : index
    %109 = vector.load %arg8[%c0_94, %c33_95] : memref<8x227xf32, #tpu.memory_space<vmem>>, vector<8x193xf32>
    %110 = arith.truncf %109 : vector<8x193xf32> to vector<8x193xbf16>
    %c7_96 = arith.constant 7 : index
    %c0_97 = arith.constant 0 : index
    %c0_98 = arith.constant 0 : index
    %111 = vector.load %arg4[%c7_96, %c0_97, %c0_98] : memref<9x8x8xbf16, #tpu.memory_space<vmem>>, vector<1x8x8xbf16>
    %112 = vector.shape_cast %111 : vector<1x8x8xbf16> to vector<8x8xbf16>
    %cst_99 = arith.constant dense<0.000000e+00> : vector<8x193xf32>
    %113 = tpu.matmul %112, %110, %cst_99 {dimension_numbers = #tpu.dot_dimension_numbers<[1], [0], [0], [1], [0, 0, 1, 1], [], []>} : vector<8x8xbf16>, vector<8x193xbf16>, vector<8x193xf32> -> vector<8x193xf32>
    %114 = arith.addf %108, %113 : vector<8x193xf32>
    %c0_100 = arith.constant 0 : index
    %c34_101 = arith.constant 34 : index
    %115 = vector.load %arg8[%c0_100, %c34_101] : memref<8x227xf32, #tpu.memory_space<vmem>>, vector<8x193xf32>
    %116 = arith.truncf %115 : vector<8x193xf32> to vector<8x193xbf16>
    %c8_102 = arith.constant 8 : index
    %c0_103 = arith.constant 0 : index
    %c0_104 = arith.constant 0 : index
    %117 = vector.load %arg4[%c8_102, %c0_103, %c0_104] : memref<9x8x8xbf16, #tpu.memory_space<vmem>>, vector<1x8x8xbf16>
    %118 = vector.shape_cast %117 : vector<1x8x8xbf16> to vector<8x8xbf16>
    %cst_105 = arith.constant dense<0.000000e+00> : vector<8x193xf32>
    %119 = tpu.matmul %118, %116, %cst_105 {dimension_numbers = #tpu.dot_dimension_numbers<[1], [0], [0], [1], [0, 0, 1, 1], [], []>} : vector<8x8xbf16>, vector<8x193xbf16>, vector<8x193xf32> -> vector<8x193xf32>
    %120 = arith.addf %114, %119 : vector<8x193xf32>
    %c0_106 = arith.constant 0 : index
    %c0_107 = arith.constant 0 : index
    %121 = vector.load %arg5[%c0_106, %c0_107] : memref<8x1xf32, #tpu.memory_space<vmem>>, vector<8x1xf32>
    %122 = vector.broadcast %121 : vector<8x1xf32> to vector<8x193xf32>
    %123 = arith.addf %120, %122 : vector<8x193xf32>
    %cst_108 = arith.constant 0.000000e+00 : f32
    %124 = vector.broadcast %cst_108 : f32 to vector<8x193xf32>
    %125 = arith.maximumf %123, %124 : vector<8x193xf32>
    %126 = vector.extract_strided_slice %125 {offsets = [0, 0], sizes = [8, 192], strides = [1, 1]} : vector<8x193xf32> to vector<8x192xf32>
    %c0_109 = arith.constant 0 : index
    %c0_110 = arith.constant 0 : index
    %c0_111 = arith.constant 0 : index
    %127 = vector.load %arg7[%c0_109, %c0_110, %c0_111] : memref<1x8x192xf32, #tpu.memory_space<vmem>>, vector<1x8x192xf32>
    %128 = vector.shape_cast %127 : vector<1x8x192xf32> to vector<8x192xf32>
    %129 = vector.shape_cast %126 : vector<8x192xf32> to vector<1x8x192xf32>
    tpu.vector_store %arg7[%c0_109, %c0_110, %c0_111], %129 {strides = array<i32>} : memref<1x8x192xf32, #tpu.memory_space<vmem>>, vector<1x8x192xf32>,
    %130 = vector.extract_strided_slice %125 {offsets = [0, 0], sizes = [8, 176], strides = [1, 1]} : vector<8x193xf32> to vector<8x176xf32>
    %131 = vector.extract_strided_slice %125 {offsets = [0, 1], sizes = [8, 176], strides = [1, 1]} : vector<8x193xf32> to vector<8x176xf32>
    %132 = arith.maximumf %130, %131 : vector<8x176xf32>
    %133 = vector.extract_strided_slice %125 {offsets = [0, 16], sizes = [8, 176], strides = [1, 1]} : vector<8x193xf32> to vector<8x176xf32>
    %134 = vector.extract_strided_slice %125 {offsets = [0, 17], sizes = [8, 176], strides = [1, 1]} : vector<8x193xf32> to vector<8x176xf32>
    %135 = arith.maximumf %133, %134 : vector<8x176xf32>
    %136 = arith.maximumf %132, %135 : vector<8x176xf32>
    %c0_112 = arith.constant 0 : index
    %c0_113 = arith.constant 0 : index
    %c0_114 = arith.constant 0 : index
    %137 = vector.load %arg6[%c0_112, %c0_113, %c0_114] : memref<1x8x176xf32, #tpu.memory_space<vmem>>, vector<1x8x176xf32>
    %138 = vector.shape_cast %137 : vector<1x8x176xf32> to vector<8x176xf32>
    %139 = vector.shape_cast %136 : vector<8x176xf32> to vector<1x8x176xf32>
    tpu.vector_store %arg6[%c0_112, %c0_113, %c0_114], %139 {strides = array<i32>} : memref<1x8x176xf32, #tpu.memory_space<vmem>>, vector<1x8x176xf32>,
    return
  }
  func.func @transform_0(%arg0: i32) -> (i32, i32, i32) {
    %c0_i32 = arith.constant 0 : i32
    %c0_i32_0 = arith.constant 0 : i32
    %c0_i32_1 = arith.constant 0 : i32
    return %arg0, %c0_i32, %c0_i32_0 : i32, i32, i32
  }
  func.func @transform_1(%arg0: i32) -> (i32, i32, i32) {
    %c0_i32 = arith.constant 0 : i32
    %c0_i32_0 = arith.constant 0 : i32
    %c0_i32_1 = arith.constant 0 : i32
    %c0_i32_2 = arith.constant 0 : i32
    return %c0_i32, %c0_i32_0, %c0_i32_1 : i32, i32, i32
  }
  func.func @transform_2(%arg0: i32) -> (i32, i32) {
    %c0_i32 = arith.constant 0 : i32
    %c0_i32_0 = arith.constant 0 : i32
    %c0_i32_1 = arith.constant 0 : i32
    return %c0_i32, %c0_i32_0 : i32, i32
  }
  func.func @transform_3(%arg0: i32) -> (i32, i32, i32) {
    %c0_i32 = arith.constant 0 : i32
    %c0_i32_0 = arith.constant 0 : i32
    %c0_i32_1 = arith.constant 0 : i32
    %c0_i32_2 = arith.constant 0 : i32
    return %c0_i32, %c0_i32_0, %c0_i32_1 : i32, i32, i32
  }
  func.func @transform_4(%arg0: i32) -> (i32, i32) {
    %c0_i32 = arith.constant 0 : i32
    %c0_i32_0 = arith.constant 0 : i32
    %c0_i32_1 = arith.constant 0 : i32
    return %c0_i32, %c0_i32_0 : i32, i32
  }
  func.func @transform_5(%arg0: i32) -> (i32, i32, i32) {
    %c0_i32 = arith.constant 0 : i32
    %c0_i32_0 = arith.constant 0 : i32
    %c0_i32_1 = arith.constant 0 : i32
    return %arg0, %c0_i32, %c0_i32_0 : i32, i32, i32
  }
  func.func @transform_6(%arg0: i32) -> (i32, i32, i32) {
    %c0_i32 = arith.constant 0 : i32
    %c0_i32_0 = arith.constant 0 : i32
    %c0_i32_1 = arith.constant 0 : i32
    return %arg0, %c0_i32, %c0_i32_0 : i32, i32, i32
  }
}

</mosaic_0001>

<bundles_post_ra>
// kernel: tpu_custom_call.1
= control target key start
LH: loop header
LB: loop body
LE: loop exit
PB: predicated region body
PF: predicated region fallthrough
CT: control target
= control target key end

     0   :  { %12 = vsyncpa [#allocation4], 0  ;;  %s2185_s0 = inlined_call_operand.vmem [shape: f32[2,4,261], index: 0, kind: input, shape index: {}]   ;;  %s2186_s1 = inlined_call_operand.vmem [shape: bf16[9,8,4], index: 1, kind: input, shape index: {}]   ;;  %s2187_s2 = inlined_call_operand.vmem [shape: f32[8,1], index: 2, kind: input, shape index: {}]   ;;  %s2188_s3 = inlined_call_operand.vmem [shape: bf16[9,8,8], index: 3, kind: input, shape index: {}]   ;;  %s2189_s4 = inlined_call_operand.vmem [shape: f32[8,1], index: 4, kind: input, shape index: {}]   ;;  %s2190_s5 = inlined_call_operand.hbm [shape: f32[2,8,176], index: 5, kind: output, shape index: {0}]   ;;  %s2191_s6 = inlined_call_operand.hbm [shape: f32[2,8,192], index: 6, kind: output, shape index: {1}]  }
   0x1   :  { %14 = vsyncpa [#allocation4 + $0x1], 0 }
   0x2   :  { %15 = vsyncpa [#allocation6], 0 }
   0x3   :  { %17 = vsyncpa [#allocation6 + $0x1], 0  ;;  %s1850_s21 = smov 0   ;;  %s1852_s22 = smov 0  }
   0x4   :  { %s1854_s23 = smov 0   ;;  %s1856_s24 = smov 0  }
   0x5 LB: > { %s1871_s25 = sadd.s32 4294967295, %s1802_s24   ;;  %s1582_s26 = sadd.s32 4294967294, %s1802_s24   ;;  %s1802_s24 = sphi %s1856_s24, %s2197_s24   ;;  %s1798_s23 = sphi %s1854_s23, %s2196_s23   ;;  %s1794_s22 = sphi %s1852_s22, %s2195_s22   ;;  %s1790_s21 = sphi %s1850_s21, %s2194_s21  }
   0x6   : > { %s1875_s27 = sadd.s32 1, %s1802_s24   ;;  %s140_s28 = sadd.s32 1, %s1798_s23 }
   0x7   : > { %s137_s29 = ssub.s32 %s1802_s24, %s1875_s27  ;;  %p150_p0 = scmp.ne.s32.totalorder %s1798_s23, %s1794_s22 }
   0x8   : > { %p138_p1 = scmp.eq.s32.totalorder %s137_s29, 0  ;;  %p151_p2 = scmp.eq.s32.totalorder %s1871_s25, 1 }
   0x9   : > { %p156_p3 = scmp.ne.s32.totalorder %s1794_s22, %s1790_s21  ;;  %p157_p4 = scmp.eq.s32.totalorder %s1582_s26, 1 }
   0xa   : > { %s1886_s30 = scalar_select %p138_p1, %s1798_s23, %s140_s28  }
   0xb   : > { %p1888_p5 = por %p151_p2, %p150_p0  ;;  %p1892_p6 = por %p157_p4, %p156_p3 }
   0xc   : > { %p1585_p7 = scmp.ge.s32.totalorder %s1802_s24, 1  ;;  %p221_p8 = scmp.lt.s32.totalorder %s1802_s24, 3 }
   0xe   : > { %p222_p9 = pnand %p1585_p7, %p221_p8 }
   0xf   : > { %p256_p10 = scmp.lt.s32.totalorder (!%p222_p9), %s1871_s25, 1  ;;  %v1804_v0 = vmov (!%p222_p9), 0   ;;  %vm283_vm0 = vcmask (!%p222_p9), 1041408   ;;  %s1805_s14 = smov (!%p222_p9), 126   ;;  %vm279_vm1 = vcmask (!%p222_p9), 31744   ;;  %v875_v13 = vld [vmem:[%s2187_s2] sm:$0xff] (!%p222_p9) }
  0x10   : > { %225 = sbr.rel (%p222_p9) target bundleno = 1049 (0x419), region = 40  ;;  %322 = vmatprep.mubr.bf16.mxu0 (!%p222_p9), %v1804_v0  ;;  %372 = vmatprep.mubr.bf16.mxu1 (!%p222_p9), %v1804_v0  ;;  %s1806_s15 = smov (!%p222_p9), 127   ;;  %v268_v6 = vld [vmem:[%s2186_s1] sm:$0xf] (!%p222_p9)  ;;  %vm277_vm2 = vcmask (!%p222_p9), 1039360   ;;  %vm395_vm3 = vcmask (!%p222_p9), 1031168  }
  0x11   : > { %1705 = vset.pattern.permute.xlu1 (!%p222_p9), %v1804_v0  ;;  %1706 = vset.pattern.permute.xlu0 (!%p222_p9), %v1804_v0  ;;  %s1807_s18 = smov (!%p222_p9), 112   ;;  %s1808_s19 = smov (!%p222_p9), 111   ;;  %vm463_vm4 = vcmask (!%p222_p9), 916480   ;;  %v1589_v21 = vld [vmem:[%s2186_s1 + $0x4] sm:$0xf] (!%p222_p9)  ;;  %vm531_vm5 = vcmask (!%p222_p9), 908288  }
  0x12   : > { %s1809_s20 = smov (!%p222_p9), 110   ;;  %s1810_s26 = smov (!%p222_p9), 96   ;;  %v1597_v27 = vld [vmem:[%s2186_s1 + $0xc] sm:$0xf] (!%p222_p9)  ;;  %vm599_vm6 = vcmask (!%p222_p9), 900096   ;;  %vm672_vm7 = vcmask (!%p222_p9), 785408  }
  0x13   : > { %s1811_s28 = smov (!%p222_p9), 95   ;;  %s1812_s29 = smov (!%p222_p9), 94   ;;  %v1594_v31 = vld [vmem:[%s2186_s1 + $0x8] sm:$0xf] (!%p222_p9)  ;;  %v1603_v37 = vld [vmem:[%s2186_s1 + $0x14] sm:$0xf] (!%p222_p9) }
  0x14   : > { %v1600_v41 = vld [vmem:[%s2186_s1 + $0x10] sm:$0xf] (!%p222_p9)  ;;  %vm746_vm8 = vcmask (!%p222_p9), 777216   ;;  %v1606_v51 = vld [vmem:[%s2186_s1 + $0x18] sm:$0xf] (!%p222_p9)  ;;  %vm820_vm9 = vcmask (!%p222_p9), 769024  }
  0x15   : > { %v1609_v52 = vld [vmem:[%s2186_s1 + $0x1c] sm:$0xf] (!%p222_p9)  ;;  %v1612_v59 = vld [vmem:[%s2186_s1 + $0x20] sm:$0xf] (!%p222_p9)  ;;  %vm886_vm10 = vcmask (!%p222_p9), 809984   ;;  %vm906_vm11 = vcmask (!%p222_p9), 1043456  }
  0x16   : > { %vm902_vm12 = vcmask (!%p222_p9), 64512   ;;  %vm1428_vm13 = vcmask (!%p222_p9), 523264  }
  0x17   : > { %s257_s9 = scalar_select %p256_p10, %s1871_s25, 1 }
  0x19   : > { %s1651_s10 = smul.u32 12, %s257_s9 }
  0x1b   : > { %s1905_s13 = scalar_lea.vmem %s2185_s0, %s1651_s10  ;;  %s1649_s10 = sshll.u32 %s1871_s25, 8 }
  0x1c   : > { %v381_v1 = vld [vmem:[%s1905_s13] sm:$0xff]  ;;  %v654_v7 = vld [vmem:[%s1905_s13 + $0x8] sm:$0xf] }
  0x1d   : > { %v385_v2 = vpack.c.bf16 %v381_v1, %v381_v1  ;;  %v383_v3 = vcombine.high %v381_v1, %v381_v1  ;;  %v660_v8 = vpack.c.bf16 %v654_v7, %v654_v7  ;;  %v728_v9 = vld [vmem:[%s1905_s13 + $0x8] sm:$0xf] }
  0x1e   : > { %v734_v10 = vpack.c.bf16 %v728_v9, %v728_v9  ;;  %v802_v11 = vld [vmem:[%s1905_s13 + $0x8] sm:$0xf]  ;;  %s2111_s13 = scalar_lea.hbm %s2191_s6, %s1649_s10 }
  0x1f   : > { %391 = vrot.lane.b32.xlu1 %v385_v2, %s1805_s14  ;;  %273 = vrot.lane.b32.xlu0 %v385_v2, %s1806_s15  ;;  %v386_v4 = vpack.c.bf16 %v383_v3, %v383_v3  ;;  %v335_v5 = vsel %vm283_vm0, %v385_v2, 0  ;;  %v808_v12 = vpack.c.bf16 %v802_v11, %v802_v11 }
  0x21   : > { %1592 = vmatprep.subr.msk.bf16.mxu1 %vm283_vm0, %v386_v4 }
  0x22   : > { %341 = vmatpush1.bf16.msra.mxu1 %v335_v5 }
  0x23   : > { %393 = vrot.lane.b32.xlu1 %v386_v4, %s1805_s14  ;;  %275 = vrot.lane.b32.xlu0 %v386_v4, %s1806_s15 }
  0x25   : > { %1593 = vmatmul.mubr.msk.bf16.vlgmr.msra.gmra.mrb[0].mxu1 %vm279_vm1, %v268_v6 }
  0x26   : > { %506 = vmatprep.mubr.bf16.mxu1 %v1804_v0 }
  0x27   : > { %461 = vrot.lane.b32.xlu1 %v386_v4, %s1807_s18  ;;  %459 = vrot.lane.b32.xlu0 %v385_v2, %s1807_s18 }
  0x2b   : > { %529 = vrot.lane.b32.xlu1 %v386_v4, %s1808_s19  ;;  %527 = vrot.lane.b32.xlu0 %v385_v2, %s1808_s19 }
  0x2f   : > { %597 = vrot.lane.b32.xlu1 %v386_v4, %s1809_s20  ;;  %595 = vrot.lane.b32.xlu0 %v385_v2, %s1809_s20 }
  0x33   : > { %668 = vrot.lane.b32.xlu1 %v386_v4, %s1810_s26  ;;  %666 = vrot.lane.b32.xlu0 %v385_v2, %s1810_s26 }
  0x37   : > { %740 = vrot.lane.b32.xlu1 %v385_v2, %s1811_s28  ;;  %670 = vrot.lane.b32.xlu0 %v660_v8, %s1810_s26 }
  0x3b   : > { %744 = vrot.lane.b32.xlu1 %v734_v10, %s1811_s28  ;;  %742 = vrot.lane.b32.xlu0 %v386_v4, %s1811_s28 }
  0x3f   : > { %816 = vrot.lane.b32.xlu1 %v386_v4, %s1812_s29  ;;  %814 = vrot.lane.b32.xlu0 %v385_v2, %s1812_s29 }
  0x43   : > { %818 = vrot.lane.b32.xlu0 %v808_v12, %s1812_s29  ;;  %878 = vperm.xlu1 %1705, %v875_v13  }
  0x91   : > { %v392_v14 = vpop.permute.xlu1 %391  ;;  %v274_v15 = vpop.permute.xlu0 %273 }
  0x95   : > { %v394_v16 = vpop.permute.xlu1 %393  ;;  %v276_v17 = vpop.permute.xlu0 %275 }
  0x96   : > { %1590 = vmatprep.subr.msk.bf16.mxu0 %vm283_vm0, %v276_v17  ;;  %v278_v18 = vsel %vm277_vm2, %v274_v15, %v276_v17  ;;  %v396_v20 = vsel %vm395_vm3, %v392_v14, %v394_v16 }
  0x97   : > { %v285_v19 = vsel %vm283_vm0, %v278_v18, 0  ;;  %v401_v25 = vsel %vm283_vm0, %v396_v20, 0 }
  0x98   : > { %291 = vmatpush1.bf16.msra.mxu0 %v285_v19 }
  0x99   : > { %v462_v22 = vpop.permute.xlu1 %461  ;;  %v460_v23 = vpop.permute.xlu0 %459  ;;  %1595 = vmatprep.subr.msk.bf16.mxu0 %vm283_vm0, %v394_v16 }
  0x9a   : > { %v464_v24 = vsel %vm463_vm4, %v460_v23, %v462_v22  ;;  %1598 = vmatprep.subr.msk.bf16.mxu1 %vm283_vm0, %v462_v22 }
  0x9b   : > { %v469_v26 = vsel %vm283_vm0, %v464_v24, 0  ;;  %1591 = vmatmul.mubr.msk.bf16.vlgmr.msra.gmra.mrb[0].mxu0 %vm279_vm1, %v1589_v21 }
  0x9c   : > { %407 = vmatpush1.bf16.msra.mxu0 %v401_v25  ;;  %475 = vmatpush1.bf16.msra.mxu1 %v469_v26 }
  0x9d   : > { %v530_v28 = vpop.permute.xlu1 %529  ;;  %v528_v29 = vpop.permute.xlu0 %527  ;;  %438 = vmatprep.mubr.bf16.mxu0 %v1804_v0 }
  0x9e   : > { %1601 = vmatprep.subr.msk.bf16.mxu0 %vm283_vm0, %v530_v28  ;;  %v532_v30 = vsel %vm531_vm5, %v528_v29, %v530_v28 }
  0x9f   : > { %1599 = vmatmul.mubr.msk.bf16.vlgmr.msra.gmra.mrb[4].mxu1 %vm279_vm1, %v1597_v27  ;;  %v537_v35 = vsel %vm283_vm0, %v532_v30, 0 }
  0xa0   : > { %642 = vmatprep.mubr.bf16.mxu1 %v1804_v0 }
  0xa1   : > { %v598_v32 = vpop.permute.xlu1 %597  ;;  %v596_v33 = vpop.permute.xlu0 %595 }
  0xa2   : > { %v600_v34 = vsel %vm599_vm6, %v596_v33, %v598_v32  ;;  %1604 = vmatprep.subr.msk.bf16.mxu1 %vm283_vm0, %v598_v32 }
  0xa3   : > { %v605_v36 = vsel %vm283_vm0, %v600_v34, 0  ;;  %1596 = vmatmul.mubr.msk.bf16.vlgmr.msra.gmra.mrb[4].mxu0 %vm279_vm1, %v1594_v31 }
  0xa4   : > { %543 = vmatpush1.bf16.msra.mxu0 %v537_v35  ;;  %611 = vmatpush1.bf16.msra.mxu1 %v605_v36 }
  0xa5   : > { %v669_v38 = vpop.permute.xlu1 %668  ;;  %v667_v39 = vpop.permute.xlu0 %666  ;;  %574 = vmatprep.mubr.bf16.mxu0 %v1804_v0 }
  0xa6   : > { %v673_v40 = vsel %vm672_vm7, %v667_v39, %v669_v38 }
  0xa7   : > { %1605 = vmatmul.mubr.msk.bf16.vlgmr.msra.gmra.mrb[8].mxu1 %vm279_vm1, %v1603_v37  ;;  %v679_v45 = vsel %vm283_vm0, %v673_v40, 0 }
  0xa8   : > { %790 = vmatprep.mubr.bf16.mxu1 %v1804_v0 }
  0xa9   : > { %v741_v42 = vpop.permute.xlu1 %740  ;;  %v671_v43 = vpop.permute.xlu0 %670 }
  0xaa   : > { %v674_v44 = vsel %vm672_vm7, %v669_v38, %v671_v43 }
  0xab   : > { %1602 = vmatmul.mubr.msk.bf16.vlgmr.msra.gmra.mrb[8].mxu0 %vm279_vm1, %v1600_v41  ;;  %1607 = vmatprep.subr.msk.bf16.mxu0 %vm283_vm0, %v674_v44 }
  0xac   : > { %685 = vmatpush1.bf16.msra.mxu0 %v679_v45  ;;  %716 = vmatprep.mubr.bf16.mxu0 %v1804_v0 }
  0xad   : > { %v745_v46 = vpop.permute.xlu1 %744  ;;  %v743_v47 = vpop.permute.xlu0 %742 }
  0xae   : > { %v747_v48 = vsel %vm746_vm8, %v741_v42, %v743_v47  ;;  %v748_v49 = vsel %vm746_vm8, %v743_v47, %v745_v46 }
  0xaf   : > { %v753_v50 = vsel %vm283_vm0, %v747_v48, 0  ;;  %1610 = vmatprep.subr.msk.bf16.mxu1 %vm283_vm0, %v748_v49 }
  0xb0   : > { %759 = vmatpush1.bf16.msra.mxu1 %v753_v50 }
  0xb1   : > { %v817_v53 = vpop.permute.xlu1 %816  ;;  %v815_v54 = vpop.permute.xlu0 %814 }
  0xb2   : > { %v821_v55 = vsel %vm820_vm9, %v815_v54, %v817_v53 }
  0xb3   : > { %1608 = vmatmul.mubr.msk.bf16.vlgmr.msra.gmra.mrb[12].mxu0 %vm279_vm1, %v1606_v51  ;;  %1611 = vmatmul.mubr.msk.bf16.vlgmr.msra.gmra.mrb[12].mxu1 %vm279_vm1, %v1609_v52  ;;  %v827_v58 = vsel %vm283_vm0, %v821_v55, 0 }
  0xb4   : > { %864 = vmatprep.mubr.bf16.mxu0 %v1804_v0  ;;  %945 = vmatprep.mubr.bf16.mxu1 %v1804_v0 }
  0xb5   : > { %v819_v56 = vpop.permute.xlu0 %818 }
  0xb6   : > { %v822_v57 = vsel %vm820_vm9, %v817_v53, %v819_v56 }
  0xb7   : > { %1613 = vmatprep.subr.msk.bf16.mxu0 %vm283_vm0, %v822_v57 }
  0xb8   : > { %833 = vmatpush1.bf16.msra.mxu0 %v827_v58  ;;  %v892_v58 = vld [vmem:[%s2188_s3] sm:$0xf] }
  0xbb   : > { %1614 = vmatmul.mubr.msk.bf16.vlgmr.msra.gmra.mrb[16].mxu0 %vm279_vm1, %v1612_v59  ;;  %v1417_v59 = vld [vmem:[%s2189_s4] sm:$0xff] }
  0xbc   : > { %995 = vmatprep.mubr.bf16.mxu0 %v1804_v0 }
  0xc2   : > { %v879_v44 = vpop.permute.xlu1 %878 }
  0xf8   : > { %v374_v60 = vpop.f32.mrb[0].mxu1 }
  0xf9   : > { %v376_v61 = vpop.f32.mrb[1].mxu1 }
  0xfa   : > { %v378_v62 = vpop.f32.mrb[2].mxu1 }
  0xfb   : > { %v379_v63 = vpop.f32.mrb[3].mxu1 }
 0x16e   : > { %v324_v1 = vpop.f32.mrb[0].mxu0 }
 0x16f   : > { %v375_v2 = vadd.f32 %v374_v60, %v324_v1  ;;  %v326_v3 = vpop.f32.mrb[1].mxu0 }
 0x170   : > { %v377_v4 = vadd.f32 %v376_v61, %v326_v3  ;;  %v328_v5 = vpop.f32.mrb[2].mxu0  ;;  %v1615_v3 = vld [vmem:[%s2188_s3 + $0x4] sm:$0xf] }
 0x171   : > { %v329_v6 = vpop.f32.mrb[3].mxu0 }
 0x172   : > { %v508_v7 = vpop.f32.mrb[4].mxu1 }
 0x173   : > { %v510_v8 = vpop.f32.mrb[5].mxu1 }
 0x174   : > { %v512_v9 = vpop.f32.mrb[6].mxu1 }
 0x175   : > { %v513_v10 = vpop.f32.mrb[7].mxu1 }
 0x176   : > { %v440_v11 = vpop.f32.mrb[4].mxu0 }
 0x177   : > { %v447_v12 = vadd.f32 %v440_v11, %v375_v2  ;;  %v442_v13 = vpop.f32.mrb[5].mxu0 }
 0x178   : > { %v448_v14 = vadd.f32 %v442_v13, %v377_v4  ;;  %v444_v15 = vpop.f32.mrb[6].mxu0  ;;  %v1623_v13 = vld [vmem:[%s2188_s3 + $0xc] sm:$0xf] }
 0x179   : > { %v515_v16 = vadd.f32 %v508_v7, %v447_v12  ;;  %v445_v17 = vpop.f32.mrb[7].mxu0  ;;  %v1620_v12 = vld [vmem:[%s2188_s3 + $0x8] sm:$0xf] }
 0x17a   : > { %v516_v18 = vadd.f32 %v510_v8, %v448_v14  ;;  %v644_v19 = vpop.f32.mrb[8].mxu1 }
 0x17b   : > { %v646_v20 = vpop.f32.mrb[9].mxu1 }
 0x17c   : > { %v648_v21 = vpop.f32.mrb[10].mxu1 }
 0x17d   : > { %v649_v22 = vpop.f32.mrb[11].mxu1  ;;  %v1626_v21 = vld [vmem:[%s2188_s3 + $0x10] sm:$0xf] }
 0x17e   : > { %v576_v23 = vpop.f32.mrb[8].mxu0  ;;  %v1629_v22 = vld [vmem:[%s2188_s3 + $0x14] sm:$0xf] }
 0x17f   : > { %v583_v24 = vadd.f32 %v576_v23, %v515_v16  ;;  %v578_v25 = vpop.f32.mrb[9].mxu0 }
 0x180   : > { %v584_v26 = vadd.f32 %v578_v25, %v516_v18  ;;  %v580_v27 = vpop.f32.mrb[10].mxu0 }
 0x181   : > { %v651_v28 = vadd.f32 %v644_v19, %v583_v24  ;;  %v581_v29 = vpop.f32.mrb[11].mxu0 }
 0x182   : > { %v652_v30 = vadd.f32 %v646_v20, %v584_v26 }
 0x186   : > { %v718_v31 = vpop.f32.mrb[12].mxu0  ;;  %v792_v32 = vpop.f32.mrb[12].mxu1 }
 0x187   : > { %v725_v33 = vadd.f32 %v718_v31, %v651_v28  ;;  %v720_v34 = vpop.f32.mrb[13].mxu0  ;;  %v794_v35 = vpop.f32.mrb[13].mxu1  ;;  %v1635_v31 = vld [vmem:[%s2188_s3 + $0x1c] sm:$0xf] }
 0x188   : > { %v726_v36 = vadd.f32 %v720_v34, %v652_v30  ;;  %v722_v37 = vpop.f32.mrb[14].mxu0  ;;  %v796_v38 = vpop.f32.mrb[14].mxu1  ;;  %v1632_v30 = vld [vmem:[%s2188_s3 + $0x18] sm:$0xf] }
 0x189   : > { %v799_v39 = vadd.f32 %v792_v32, %v725_v33  ;;  %v723_v40 = vpop.f32.mrb[15].mxu0  ;;  %v797_v41 = vpop.f32.mrb[15].mxu1 }
 0x18a   : > { %v800_v42 = vadd.f32 %v794_v35, %v726_v36  ;;  %v1638_v36 = vld [vmem:[%s2188_s3 + $0x20] sm:$0xf] }
 0x18e   : > { %v866_v43 = vpop.f32.mrb[16].mxu0 }
 0x18f   : > { %v873_v45 = vadd.f32 %v866_v43, %v799_v39  ;;  %v868_v46 = vpop.f32.mrb[17].mxu0 }
 0x190   : > { %v874_v47 = vadd.f32 %v868_v46, %v800_v42  ;;  %v870_v48 = vpop.f32.mrb[18].mxu0 }
 0x191   : > { %v881_v49 = vadd.f32 %v879_v44, %v873_v45  ;;  %v871_v50 = vpop.f32.mrb[19].mxu0 }
 0x192   : > { %v882_v51 = vadd.f32 %v879_v44, %v874_v47 }
 0x193   : > { %v883_v52 = vmax.f32 %v881_v49, 0.0 }
 0x194   : > { %v884_v53 = vmax.f32 %v882_v51, 0.0 }
 0x195   : > { %v890_v54 = vpack.c.bf16 %v883_v52, %v883_v52 }
 0x196   : > { %887 = vst.msk [vmem:[#allocation2 + $0x8] sm:$0xff] %vm886_vm10, %v884_v53 }
 0x197   : > { %897 = vrot.lane.b32.xlu0 %v890_v54, %s1806_s15  ;;  %v958_v57 = vsel %vm906_vm11, %v890_v54, 0 }
 0x19b   : > { %1006 = vrot.lane.b32.xlu0 %v890_v54, %s1805_s14 }
 0x19d   : > { %v889_v55 = vld [vmem:[#allocation2 + $0x8] sm:$0xff] }
 0x19e   : > { %v891_v56 = vpack.c.bf16 %v889_v55, %v889_v55 }
 0x19f   : > { %1065 = vrot.lane.b32.xlu0 %v890_v54, %s1807_s18 }
 0x1a0   : > { %899 = vrot.lane.b32.xlu1 %v891_v56, %s1806_s15  ;;  %1618 = vmatprep.subr.msk.bf16.mxu0 %vm906_vm11, %v891_v56 }
 0x1a1   : > { %964 = vmatpush1.bf16.msra.mxu0 %v958_v57 }
 0x1a3   : > { %1124 = vrot.lane.b32.xlu0 %v890_v54, %s1808_s19 }
 0x1a4   : > { %1008 = vrot.lane.b32.xlu1 %v891_v56, %s1805_s14  ;;  %1619 = vmatmul.mubr.msk.bf16.vlgmr.msra.gmra.mrb[20].mxu0 %vm902_vm12, %v892_v58 }
 0x1a5   : > { %1111 = vmatprep.mubr.bf16.mxu0 %v1804_v0 }
 0x1a7   : > { %1183 = vrot.lane.b32.xlu0 %v890_v54, %s1809_s20 }
 0x1a8   : > { %1067 = vrot.lane.b32.xlu1 %v891_v56, %s1807_s18 }
 0x1ab   : > { %1242 = vrot.lane.b32.xlu0 %v890_v54, %s1810_s26 }
 0x1ac   : > { %1126 = vrot.lane.b32.xlu1 %v891_v56, %s1808_s19  ;;  %s1813_s19 = smov [#allocation5]  }
 0x1af   : > { %1301 = vrot.lane.b32.xlu0 %v890_v54, %s1811_s28 }
 0x1b0   : > { %1185 = vrot.lane.b32.xlu1 %v891_v56, %s1809_s20  ;;  %s1712_s20 = sshll.u32 %s1813_s19, 4  ;;  %s1713_s20 = int_to_ptr.vmem [resolvable:$false] %s1712_s20 }
 0x1b3   : > { %1360 = vrot.lane.b32.xlu0 %v890_v54, %s1812_s29 }
 0x1b4   : > { %1244 = vrot.lane.b32.xlu1 %v891_v56, %s1810_s26 }
 0x1b7   : > { %1420 = vperm.xlu0 %1706, %v1417_v59  }
 0x1b8   : > { %1303 = vrot.lane.b32.xlu1 %v891_v56, %s1811_s28  ;;  %s2098_s28 = sand.u32 1, %s1794_s22  }
 0x1b9   : > { %s1463_s14 = scalar_lea.sflag [#allocation6], %s2098_s28 }
 0x1bc   : > { %1362 = vrot.lane.b32.xlu1 %v891_v56, %s1812_s29  ;;  %s1586_s29 = sshll.u32 %s2098_s28, 4 }
 0x1bd   : > { %s255_s9 = scalar_lea.vmem [#allocation5], %s1586_s29 }
 0x1be   : > { %s1491_s16 = sshll.u32 %s255_s9, 4  ;;  %s1492_s16 = int_to_ptr.vmem [resolvable:$true] %s1491_s16 }
 0x1bf   : > { %s1708_s17 = scalar_lea.vmem %s1492_s16, 256  ;;  %p1715_p0 = scmp.lt.s32.totalorder %s1492_s16, %s1713_s20 }
 0x1c0   : > { %p1709_p11 = scmp.ne.s32.totalorder %s1492_s16, %s1708_s17 }
 0x1c2   : > { %p1710_p12 = pnand %p1709_p11, %p1888_p5 }
 0x1c4   : > { %p1711_p13 = pneg %p1710_p12 }
 0x209   : > { %v898_v60 = vpop.permute.xlu0 %897 }
 0x20d   : > { %v1007_v61 = vpop.permute.xlu0 %1006 }
 0x211   : > { %v1066_v62 = vpop.permute.xlu0 %1065 }
 0x212   : > { %v900_v63 = vpop.permute.xlu1 %899 }
 0x213   : > { %v901_v1 = vsel %vm277_vm2, %v898_v60, %v900_v63  ;;  %1616 = vmatprep.subr.msk.bf16.mxu1 %vm906_vm11, %v900_v63 }
 0x214   : > { %v908_v2 = vsel %vm906_vm11, %v901_v1, 0 }
 0x215   : > { %914 = vmatpush1.bf16.msra.mxu1 %v908_v2  ;;  %v1125_v5 = vpop.permute.xlu0 %1124 }
 0x216   : > { %v1009_v4 = vpop.permute.xlu1 %1008 }
 0x217   : > { %v1010_v6 = vsel %vm395_vm3, %v1007_v61, %v1009_v4  ;;  %1621 = vmatprep.subr.msk.bf16.mxu1 %vm906_vm11, %v1009_v4 }
 0x218   : > { %v1015_v7 = vsel %vm906_vm11, %v1010_v6, 0  ;;  %1617 = vmatmul.mubr.msk.bf16.vlgmr.msra.gmra.mrb[16].mxu1 %vm902_vm12, %v1615_v3 }
 0x219   : > { %1021 = vmatpush1.bf16.msra.mxu1 %v1015_v7  ;;  %1052 = vmatprep.mubr.bf16.mxu1 %v1804_v0  ;;  %v1184_v11 = vpop.permute.xlu0 %1183 }
 0x21a   : > { %v1068_v8 = vpop.permute.xlu1 %1067 }
 0x21b   : > { %v1069_v9 = vsel %vm463_vm4, %v1066_v62, %v1068_v8  ;;  %1624 = vmatprep.subr.msk.bf16.mxu0 %vm906_vm11, %v1068_v8 }
 0x21c   : > { %v1074_v10 = vsel %vm906_vm11, %v1069_v9, 0 }
 0x21d   : > { %1080 = vmatpush1.bf16.msra.mxu0 %v1074_v10  ;;  %v1243_v18 = vpop.permute.xlu0 %1242 }
 0x21e   : > { %v1127_v14 = vpop.permute.xlu1 %1126 }
 0x21f   : > { %v1128_v15 = vsel %vm531_vm5, %v1125_v5, %v1127_v14  ;;  %1627 = vmatprep.subr.msk.bf16.mxu1 %vm906_vm11, %v1127_v14 }
 0x220   : > { %v1133_v16 = vsel %vm906_vm11, %v1128_v15, 0  ;;  %1622 = vmatmul.mubr.msk.bf16.vlgmr.msra.gmra.mrb[20].mxu1 %vm902_vm12, %v1620_v12  ;;  %1625 = vmatmul.mubr.msk.bf16.vlgmr.msra.gmra.mrb[24].mxu0 %vm902_vm12, %v1623_v13 }
 0x221   : > { %1139 = vmatpush1.bf16.msra.mxu1 %v1133_v16  ;;  %1170 = vmatprep.mubr.bf16.mxu1 %v1804_v0  ;;  %v1302_v26 = vpop.permute.xlu0 %1301 }
 0x222   : > { %v1186_v17 = vpop.permute.xlu1 %1185  ;;  %1229 = vmatprep.mubr.bf16.mxu0 %v1804_v0 }
 0x223   : > { %v1187_v19 = vsel %vm599_vm6, %v1184_v11, %v1186_v17  ;;  %1630 = vmatprep.subr.msk.bf16.mxu0 %vm906_vm11, %v1186_v17 }
 0x224   : > { %v1192_v20 = vsel %vm906_vm11, %v1187_v19, 0 }
 0x225   : > { %1198 = vmatpush1.bf16.msra.mxu0 %v1192_v20  ;;  %v1361_v32 = vpop.permute.xlu0 %1360 }
 0x226   : > { %v1245_v23 = vpop.permute.xlu1 %1244 }
 0x227   : > { %v1246_v24 = vsel %vm672_vm7, %v1243_v18, %v1245_v23  ;;  %1633 = vmatprep.subr.msk.bf16.mxu1 %vm906_vm11, %v1245_v23 }
 0x228   : > { %v1251_v25 = vsel %vm906_vm11, %v1246_v24, 0  ;;  %1628 = vmatmul.mubr.msk.bf16.vlgmr.msra.gmra.mrb[24].mxu1 %vm902_vm12, %v1626_v21  ;;  %1631 = vmatmul.mubr.msk.bf16.vlgmr.msra.gmra.mrb[28].mxu0 %vm902_vm12, %v1629_v22 }
 0x229   : > { %1257 = vmatpush1.bf16.msra.mxu1 %v1251_v25  ;;  %1288 = vmatprep.mubr.bf16.mxu1 %v1804_v0 }
 0x22a   : > { %v1304_v27 = vpop.permute.xlu1 %1303  ;;  %1347 = vmatprep.mubr.bf16.mxu0 %v1804_v0 }
 0x22b   : > { %v1305_v28 = vsel %vm746_vm8, %v1302_v26, %v1304_v27  ;;  %1636 = vmatprep.subr.msk.bf16.mxu0 %vm906_vm11, %v1304_v27 }
 0x22c   : > { %v1310_v29 = vsel %vm906_vm11, %v1305_v28, 0 }
 0x22d   : > { %1316 = vmatpush1.bf16.msra.mxu0 %v1310_v29 }
 0x22e   : > { %v1363_v33 = vpop.permute.xlu1 %1362 }
 0x22f   : > { %v1364_v34 = vsel %vm820_vm9, %v1361_v32, %v1363_v33  ;;  %1639 = vmatprep.subr.msk.bf16.mxu1 %vm906_vm11, %v1363_v33 }
 0x230   : > { %v1369_v35 = vsel %vm906_vm11, %v1364_v34, 0  ;;  %1634 = vmatmul.mubr.msk.bf16.vlgmr.msra.gmra.mrb[28].mxu1 %vm902_vm12, %v1632_v30  ;;  %1637 = vmatmul.mubr.msk.bf16.vlgmr.msra.gmra.mrb[32].mxu0 %vm902_vm12, %v1635_v31 }
 0x231   : > { %1375 = vmatpush1.bf16.msra.mxu1 %v1369_v35  ;;  %1406 = vmatprep.mubr.bf16.mxu1 %v1804_v0 }
 0x236   : > { %v1421_v20 = vpop.permute.xlu0 %1420 }
 0x238   : > { %1640 = vmatmul.mubr.msk.bf16.vlgmr.msra.gmra.mrb[32].mxu1 %vm902_vm12, %v1638_v36 }
 0x277   : > { %v997_v37 = vpop.f32.mrb[20].mxu0 }
 0x278   : > { %v999_v38 = vpop.f32.mrb[21].mxu0 }
 0x279   : > { %v1001_v39 = vpop.f32.mrb[22].mxu0 }
 0x27a   : > { %v1002_v40 = vpop.f32.mrb[23].mxu0 }
 0x2eb   : > { %v947_v41 = vpop.f32.mrb[16].mxu1 }
 0x2ec   : > { %v949_v42 = vpop.f32.mrb[17].mxu1  ;;  %v998_v43 = vadd.f32 %v997_v37, %v947_v41 }
 0x2ed   : > { %v951_v44 = vpop.f32.mrb[18].mxu1  ;;  %v1000_v45 = vadd.f32 %v999_v38, %v949_v42 }
 0x2ee   : > { %v952_v46 = vpop.f32.mrb[19].mxu1 }
 0x2f3   : > { %v1054_v47 = vpop.f32.mrb[20].mxu1  ;;  %v1113_v48 = vpop.f32.mrb[24].mxu0 }
 0x2f4   : > { %v1061_v49 = vadd.f32 %v1054_v47, %v998_v43  ;;  %v1056_v0 = vpop.f32.mrb[21].mxu1  ;;  %v1115_v50 = vpop.f32.mrb[25].mxu0 }
 0x2f5   : > { %v1062_v51 = vadd.f32 %v1056_v0, %v1000_v45  ;;  %v1058_v52 = vpop.f32.mrb[22].mxu1  ;;  %v1117_v53 = vpop.f32.mrb[26].mxu0 }
 0x2f6   : > { %v1120_v54 = vadd.f32 %v1113_v48, %v1061_v49  ;;  %v1059_v55 = vpop.f32.mrb[23].mxu1  ;;  %v1118_v56 = vpop.f32.mrb[27].mxu0 }
 0x2f7   : > { %v1121_v57 = vadd.f32 %v1115_v50, %v1062_v51 }
 0x2fb   : > { %v1172_v58 = vpop.f32.mrb[24].mxu1  ;;  %v1231_v59 = vpop.f32.mrb[28].mxu0 }
 0x2fc   : > { %v1179_v60 = vadd.f32 %v1172_v58, %v1120_v54  ;;  %v1174_v61 = vpop.f32.mrb[25].mxu1  ;;  %v1233_v62 = vpop.f32.mrb[29].mxu0 }
 0x2fd   : > { %v1180_v63 = vadd.f32 %v1174_v61, %v1121_v57  ;;  %v1176_v1 = vpop.f32.mrb[26].mxu1  ;;  %v1235_v2 = vpop.f32.mrb[30].mxu0 }
 0x2fe   : > { %v1238_v3 = vadd.f32 %v1231_v59, %v1179_v60  ;;  %v1177_v4 = vpop.f32.mrb[27].mxu1  ;;  %v1236_v5 = vpop.f32.mrb[31].mxu0 }
 0x2ff   : > { %v1239_v6 = vadd.f32 %v1233_v62, %v1180_v63 }
 0x303   : > { %v1290_v7 = vpop.f32.mrb[28].mxu1  ;;  %v1349_v8 = vpop.f32.mrb[32].mxu0 }
 0x304   : > { %v1297_v9 = vadd.f32 %v1290_v7, %v1238_v3  ;;  %v1292_v10 = vpop.f32.mrb[29].mxu1  ;;  %v1351_v11 = vpop.f32.mrb[33].mxu0 }
 0x305   : > { %v1298_v12 = vadd.f32 %v1292_v10, %v1239_v6  ;;  %v1294_v13 = vpop.f32.mrb[30].mxu1  ;;  %v1353_v14 = vpop.f32.mrb[34].mxu0 }
 0x306   : > { %v1356_v15 = vadd.f32 %v1349_v8, %v1297_v9  ;;  %v1295_v16 = vpop.f32.mrb[31].mxu1  ;;  %v1354_v17 = vpop.f32.mrb[35].mxu0 }
 0x307   : > { %v1357_v18 = vadd.f32 %v1351_v11, %v1298_v12 }
 0x30b   : > { %v1408_v19 = vpop.f32.mrb[32].mxu1 }
 0x30c   : > { %v1415_v21 = vadd.f32 %v1408_v19, %v1356_v15  ;;  %v1410_v22 = vpop.f32.mrb[33].mxu1 }
 0x30d   : > { %v1416_v23 = vadd.f32 %v1410_v22, %v1357_v18  ;;  %v1412_v24 = vpop.f32.mrb[34].mxu1 }
 0x30e   : > { %v1423_v25 = vadd.f32 %v1421_v20, %v1415_v21  ;;  %v1413_v26 = vpop.f32.mrb[35].mxu1 }
 0x30f   : > { %v1424_v27 = vadd.f32 %v1421_v20, %v1416_v23 }
 0x310   : > { %v1425_v28 = vmax.f32 %v1423_v25, 0.0 }
 0x311   : > { %v1426_v29 = vmax.f32 %v1424_v27, 0.0 }
 0x312   : > { %1432 = vrot.lane.b32.xlu1 %v1425_v28, %s1806_s15  ;;  %1427 = vst [vmem:[%s255_s9] sm:$0xff] %v1425_v28 }
 0x313   : > { %1429 = vst.msk [vmem:[%s255_s9 + $0x8] sm:$0xff] %vm1428_vm13, %v1426_v29 }
 0x316   : > { %1434 = vrot.lane.b32.xlu1 %v1426_v29, %s1806_s15  ;;  %s1714_s15 = scalar_lea.vmem %s1713_s20, 512 }
 0x317   : > { %p1716_p1 = scmp.lt.s32.totalorder %s1714_s15, %s1708_s17 }
 0x319   : > { %p1717_p2 = por %p1716_p1, %p1715_p0 }
 0x31b   : > { %p1718_p3 = pnand %p1717_p2, %p1711_p13 }
 0x384   : > { %v1433_v30 = vpop.permute.xlu1 %1432 }
 0x385   : > { %1721 = shalt.err (!%p1718_p3)
}
 0x386   : > { %s1722_s26 = scalar_lea.hbm %s2111_s13, 256  ;;  %s1726_s12 = scalar_lea.hbm %s2191_s6, 512 }
 0x387   : > { %p1723_p4 = scmp.ne.s32.totalorder %s2111_s13, %s1722_s26  ;;  %p1727_p9 = scmp.lt.u32.totalorder %s2111_s13, %s2191_s6 }
 0x388   : > { %p1728_p10 = scmp.lt.u32.totalorder %s1726_s12, %s1722_s26  ;;  %p1730_p12 = scmp.lt.u32.totalorder %s1722_s26, %s2111_s13 }
 0x389   : > { %p1724_p7 = pnand %p1723_p4, %p1888_p5 }
 0x38a   : > { %p1729_p11 = por %p1728_p10, %p1727_p9 }
 0x38b   : > { %p1725_p8 = pneg %p1724_p7 }
 0x38c   : > { %p1731_p13 = por %p1730_p12, %p1729_p11 }
 0x38e   : > { %p1732_p0 = pnand %p1731_p13, %p1725_p8 }
 0x390   : > { %1735 = shalt.err (!%p1732_p0)
}
 0x391   : > { %1653 = dma.vmem_to_hbm [thread:$0]  (%p1888_p5), %s1492_s16, 256, %s2111_s13, %s1463_s14   ;;  %v1435_v31 = vpop.permute.xlu1 %1434  ;;  %vm1455_vm14 = vcmask 392192  }
 0x392   : > { %v1437_v32 = vsel %vm277_vm2, %v1433_v30, %v1435_v31  ;;  %v1441_v33 = vmax.f32 %v1426_v29, %v1435_v31  ;;  %s248_s17 = scalar_lea.vmem [#allocation3], %s1586_s29  ;;  %s2142_s14 = scalar_lea.hbm %s2190_s5, %s1649_s10 }
 0x393   : > { %v1440_v34 = vmax.f32 %v1425_v28, %v1437_v32  ;;  %s1477_s15 = sshll.u32 %s248_s17, 4  ;;  %s1814_s26 = smov [#allocation3]   ;;  %s2144_s15 = int_to_ptr.vmem [resolvable:$true] %s1477_s15 }
 0x394   : > { %1446 = vrot.lane.b32.xlu1 %v1441_v33, %s1807_s18  ;;  %s1736_s29 = scalar_lea.vmem %s2144_s15, 256  ;;  %s1740_s9 = sshll.u32 %s1814_s26, 4  ;;  %s1741_s9 = int_to_ptr.vmem [resolvable:$false] %s1740_s9 }
 0x395   : > { %1444 = vrot.lane.b32.xlu0 %v1440_v34, %s1807_s18  ;;  %s1458_s18 = scalar_lea.sflag [#allocation4], %s2098_s28  ;;  %p1737_p1 = scmp.ne.s32.totalorder %s2144_s15, %s1736_s29 }
 0x396   : > { %s1742_s25 = scalar_lea.vmem %s1741_s9, 512  ;;  %p1743_p4 = scmp.lt.s32.totalorder %s2144_s15, %s1741_s9 }
 0x397   : > { %p1738_p2 = pnand %p1737_p1, %p1888_p5  ;;  %p1744_p7 = scmp.lt.s32.totalorder %s1742_s25, %s1736_s29 }
 0x399   : > { %p1739_p3 = pneg %p1738_p2  ;;  %p1745_p8 = por %p1744_p7, %p1743_p4 }
 0x39b   : > { %p1746_p9 = pnand %p1745_p8, %p1739_p3 }
 0x406   : > { %v1447_v35 = vpop.permute.xlu1 %1446 }
 0x407   : > { %v1453_v36 = vmax.f32 %v1441_v33, %v1447_v35  ;;  %v1445_v37 = vpop.permute.xlu0 %1444 }
 0x408   : > { %v1449_v38 = vsel %vm463_vm4, %v1445_v37, %v1447_v35 }
 0x409   : > { %1456 = vst.msk [vmem:[%s248_s17 + $0x8] sm:$0xff] %vm1455_vm14, %v1453_v36  ;;  %v1452_v39 = vmax.f32 %v1440_v34, %v1449_v38 }
 0x40b   : > { %1454 = vst [vmem:[%s248_s17] sm:$0xff] %v1452_v39 }
 0x40c   : > { %1749 = shalt.err (!%p1746_p9)
}
 0x40d   : > { %s1750_s28 = scalar_lea.hbm %s2142_s14, 256  ;;  %s1754_s12 = scalar_lea.hbm %s2190_s5, 512 }
 0x40e   : > { %p1751_p10 = scmp.ne.s32.totalorder %s2142_s14, %s1750_s28  ;;  %p1755_p13 = scmp.lt.u32.totalorder %s2142_s14, %s2190_s5 }
 0x40f   : > { %p1756_p0 = scmp.lt.u32.totalorder %s1754_s12, %s1750_s28  ;;  %p1758_p2 = scmp.lt.u32.totalorder %s1750_s28, %s2142_s14 }
 0x410   : > { %p1752_p11 = pnand %p1751_p10, %p1888_p5 }
 0x411   : > { %p1757_p1 = por %p1756_p0, %p1755_p13 }
 0x412   : > { %p1753_p12 = pneg %p1752_p11 }
 0x413   : > { %p1759_p3 = por %p1758_p2, %p1757_p1 }
 0x415   : > { %p1760_p4 = pnand %p1759_p3, %p1753_p12 }
 0x417   : > { %1763 = shalt.err (!%p1760_p4)
}
 0x418   : > { %1652 = dma.vmem_to_hbm [thread:$0]  (%p1888_p5), %s2144_s15, 256, %s2142_s14, %s1458_s18  }
 0x419 PF: > { %p1663_p7 = scmp.ge.s32.totalorder %s1802_s24, 2  ;;  %s1503_s17 = sand.u32 1, %s1790_s21  }
 0x41a   : > { %s1504_s13 = scalar_lea.sflag [#allocation4], %s1503_s17 }
 0x41b   : > { %p1657_p8 = pnand %p1663_p7, %p1892_p6 }
 0x41d   : > { %1781 = dma.done.wait (!%p1657_p8), %s1504_s13, 256  }
 0x41e   : > { %1783 = vsyncadd (!%p1657_p8), %s1504_s13, 4294967040  ;;  %s1513_s16 = scalar_lea.sflag [#allocation6], %s1503_s17 }
 0x41f   : > { %1785 = dma.done.wait (!%p1657_p8), %s1513_s16, 256  }
 0x420   : > { %1787 = vsyncadd (!%p1657_p8), %s1513_s16, 4294967040  ;;  %p20_p5 = scmp.ge.s32.totalorder %s1875_s27, 4   ;;  %s2194_s21 = smov %s1794_s22 }
 0x421   : > { %s2195_s22 = smov %s1798_s23  ;;  %s2196_s23 = smov %s1886_s30 }
 0x422   : > { %s2197_s24 = smov %s1875_s27  ;;  %22 = sbr.rel (!%p20_p5) target bundleno = 5 (0x5), region = 108 }
 0x429   :  { %1518 = vsyncpa [#allocation4], 1 }
 0x42a   :  { %1520 = vsyncpa [#allocation4 + $0x1], 1 }
 0x42b   :  { %1521 = vsyncpa [#allocation6], 1 }
 0x42c   :  { %1523 = vsyncpa [#allocation6 + $0x1], 1 }

</bundles_post_ra>
